<compile_context>
chip_gen: v7x
topology: tpu7x:2x2x1
jax: 0.10.0
libtpu: 0.0.40
codegen_flags: <defaults>
</compile_context>

<pallas_src>
import jax
import jax.numpy as jnp
from jax import lax
from jax.experimental import pallas as pl
from jax.experimental.pallas import tpu as pltpu


# ---------------------------------------------------------------------------
# One-shot parameter kernel (runs once per forward; not on the hot path).
# Inputs are the *transposed* adjacency / phi_p so that phi^T is computed
# directly (softmax over axis 0) and no in-kernel transpose is required.
# ---------------------------------------------------------------------------
def _param_kernel(adj_t_ref, phi_p_t_ref, beta_row_ref, npop_col_ref,
                  m_ref, cst_ref):
    adj_t = adj_t_ref[...]                                      # (N, N) = adj^T
    # phi^T: softmax over torch dim=1  ==  axis 0 in the transposed layout.
    z = jnp.maximum(phi_p_t_ref[...] * adj_t, 0.0)
    z = z - jnp.max(z, axis=0, keepdims=True)
    e = jnp.exp(z)
    phi_t = (e / jnp.sum(e, axis=0, keepdims=True)) * adj_t     # (N, N) = phi^T
    # Np[c] = sum_k phi[c, k] * num_population[k]   -> (1, N) row indexed by c.
    np_row = jnp.sum(phi_t * npop_col_ref[...], axis=0, keepdims=True)
    # cst[c] = beta[c] / Np[c].  NOTE: Np[c] == 0 (fully isolated node) gives
    # inf/nan, matching the torch reference's behaviour (documented precondition).
    cst_ref[...] = beta_row_ref[...] / np_row                   # (1, N)
    # rowsum[a] = sum_c phi[a, c]                    -> (1, N) row indexed by a.
    rowsum_row = jnp.sum(phi_t, axis=0, keepdims=True)
    # M[c, a] = phi[a, c] * rowsum[a]   (Kai^T with the beta/Np factor folded
    # into the hot kernel's sx instead).
    m_ref[...] = phi_t * rowsum_row


# ---------------------------------------------------------------------------
# Hot kernel: one batch tile per grid step.
# ---------------------------------------------------------------------------
def _sir_batch_kernel(x_ref, m_ref, npop_ref, cst_ref, scal_ref, out_ref):
    tb, t, n = x_ref.shape
    one_plus_gama = scal_ref[0, 0]                              # SMEM scalar

    def time_slice(i):
        # (TB, 1, N) slab -> (TB, N); static i, robust on any Pallas version.
        return x_ref[:, pl.ds(i, 1), :][:, 0, :]

    # Single forward pass over T carrying (running_min, running_sum):
    # whenever a strictly smaller value appears the sum restarts, so after the
    # loop run_sum == sum_{t >= first argmin} x[t]  — exactly the torch mask
    # semantics (torch.min returns the first minimal index).  x_last falls out
    # of the final iteration.  T is static and modest, so a fully unrolled
    # Python loop is used (equivalent to lax.fori_loop(..., unroll=True)).
    xt = time_slice(0)
    run_min = xt
    run_sum = xt
    for i in range(1, t):
        xt = time_slice(i)
        run_sum = jnp.where(xt < run_min, 0.0, run_sum) + xt
        run_min = jnp.minimum(run_min, xt)
    x_last = xt                                                 # (TB, N)

    # S = num_population - masked_sum * (1 + gama)
    s = npop_ref[...] - run_sum * one_plus_gama                 # (TB, N)
    # Fold cst[c] = beta[c]/Np[c] into sx (row broadcast over the batch tile).
    sx = s * x_last * cst_ref[...]                              # (TB, N)
    # out[b, a] = sum_c Kai[a, c] * S[b, c] * x_last[b, c] + x_last[b, a]
    #           = (sx @ M)[b, a] + x_last[b, a]       (M is natural layout)
    out = jnp.dot(sx, m_ref[...],
                  preferred_element_type=jnp.float32) + x_last
    out_ref[...] = out.astype(out_ref.dtype)


# ---------------------------------------------------------------------------
# Generation-aware VMEM sizing
# ---------------------------------------------------------------------------
def _round_up(v, m):
    return ((v + m - 1) // m) * m


def _vmem_limit_bytes():
    """Scoped VMEM limit: ~1/3 of physical capacity, capped at 48 MiB.

    v5e/v6e (128 MiB physical) -> ~42 MiB; v7x (64 MiB physical) -> ~21 MiB.
    """
    cap = 64 << 20  # conservative fallback (v7x per-TC VMEM)
    try:
        info = pltpu.get_tpu_info()
        c = getattr(info, "vmem_capacity_bytes", None)
        if c:
            cap = int(c)
    except Exception:
        pass
    return int(max(min(cap // 3, 48 << 20), 16 << 20))


def _pick_batch_tile(B, T, N, max_batch_tile, vmem_limit_bytes):
    """Largest batch tile whose (8,128)-padded VMEM footprint fits the limit."""
    lane_n = _round_up(N, 128)
    sub_t = _round_up(T, 8)
    # Fixed residents (the pipeline double-buffers every BlockSpec input):
    #   M (N, N) + num_population row + cst row.
    fixed = 2 * _round_up(N, 8) * lane_n * 4 + 2 * (2 * 8 * lane_n * 4)
    # Per batch row: double-buffered x slab + double-buffered output row
    # + ~6 (TB, N) f32 in-kernel temporaries (run_min/run_sum/s/sx/out/...).
    per_row = (2 * sub_t + 8) * lane_n * 4
    tb = max(1, (vmem_limit_bytes - fixed) // per_row)
    if max_batch_tile is not None:
        tb = min(tb, max(1, int(max_batch_tile)))
    tb = min(tb, B)

    if tb >= B:
        if B <= 16:
            return B            # one block; block dim == full array dim is legal
        # Keep >= 2 grid steps so the "parallel" batch axis can be split across
        # the two TensorCores on megacore parts (v7x).
        tb = -(-B // 2)

    # Sublane-align the (tb, N) output block (8-row granularity).
    tb = max(8, (tb // 8) * 8)
    tb = min(tb, B)
    if tb >= B:
        return B
    # Prefer a tile that divides B exactly (no ragged last block).  Otherwise
    # Pallas masks the ragged block's stores — no host-side padding of x.
    for cand in range(tb, 7, -8):
        if B % cand == 0:
            return cand
    return tb


# ---------------------------------------------------------------------------
# Wrapper
# ---------------------------------------------------------------------------
def sir_gnn_forward(x, ind, adj, phi_p, beta, gama, num_population,
                    *, max_batch_tile=None):
    """Pallas implementation of SIR_GNN.forward. Returns (output, ind)."""
    x = jnp.asarray(x, jnp.float32)
    B, T, N = x.shape
    adj = jnp.asarray(adj, jnp.float32).reshape(N, N)
    phi_p = jnp.asarray(phi_p, jnp.float32).reshape(N, N)
    beta_row = jnp.asarray(beta, jnp.float32).reshape(1, N)        # == beta[:, 0]
    npop_col = jnp.asarray(num_population, jnp.float32).reshape(N, 1)
    npop_row = jnp.asarray(num_population, jnp.float32).reshape(1, N)
    # gama is (beta_size=1, 1) in the module -> a scalar; pre-fold (1 + gama).
    scal = (1.0 + jnp.asarray(gama, jnp.float32).reshape(-1)[0]).reshape(1, 1)

    # ---- one-shot parameter kernel: M = Kai^T-without-cst, cst row ----
    vmem = pl.BlockSpec(memory_space=pltpu.MemorySpace.VMEM)
    m, cst_row = pl.pallas_call(
        _param_kernel,
        out_shape=(jax.ShapeDtypeStruct((N, N), jnp.float32),
                   jax.ShapeDtypeStruct((1, N), jnp.float32)),
        in_specs=[vmem, vmem, vmem, vmem],
        out_specs=(vmem, vmem),
    )(adj.T, phi_p.T, beta_row, npop_col)

    # ---- batch-tiled hot kernel ----
    vmem_limit = _vmem_limit_bytes()
    tb = _pick_batch_tile(B, T, N, max_batch_tile, vmem_limit)
    nb = pl.cdiv(B, tb)

    out = pl.pallas_call(
        _sir_batch_kernel,
        out_shape=jax.ShapeDtypeStruct((B, N), jnp.float32),
        grid_spec=pltpu.PrefetchScalarGridSpec(
            num_scalar_prefetch=0,
            grid=(nb,),
            in_specs=[
                pl.BlockSpec((tb, T, N), lambda b: (b, 0, 0)),          # x tile
                pl.BlockSpec((N, N), lambda b: (0, 0)),                 # M (resident)
                pl.BlockSpec((1, N), lambda b: (0, 0)),                 # num_population
                pl.BlockSpec((1, N), lambda b: (0, 0)),                 # cst row
                pl.BlockSpec(memory_space=pltpu.MemorySpace.SMEM),      # (1+gama) scalar
            ],
            out_specs=pl.BlockSpec((tb, N), lambda b: (b, 0)),
        ),
        compiler_params=pltpu.CompilerParams(
            dimension_semantics=("parallel",),
            vmem_limit_bytes=int(vmem_limit),
        ),
    )(x, m, npop_row, cst_row, scal)

    return out, ind


# ---------------------------------------------------------------------------
# Pure-JAX faithful transcription of the torch forward (for checking)
# ---------------------------------------------------------------------------
def sir_gnn_reference(x, ind, adj, phi_p, beta, gama, num_population):
    B, T, N = x.shape
    min_idx = jnp.argmin(x, axis=1)                                   # (B,N)
    t = jnp.arange(T)[None, :, None]
    mask = (t >= min_idx[:, None, :]).astype(x.dtype)                 # (B,T,N)
    S = num_population[None, :] - jnp.sum(mask * x, axis=1) * (1.0 + gama)
    phi = jax.nn.softmax(jax.nn.relu(phi_p * adj), axis=1)
    phi = phi * adj
    Np = phi @ num_population                                         # (N,)
    phi_si = phi[:, :, None] * phi[:, None, :]                        # (N,N,N)
    cst = beta[:, 0] * (1.0 / Np[None, :])                            # (1,N)
    Kai = jnp.sum(cst * phi_si, axis=1)                               # (N,N)
    Kai_b = Kai[None, :, :] * S[:, None, :]                           # (B,N,N)
    x_last = jnp.transpose(x[:, -1:, :], (0, 2, 1))                   # (B,N,1)
    out = jnp.matmul(Kai_b, x_last)
    return out[..., 0] + x_last[..., 0], ind


if __name__ == "__main__":
    key = jax.random.PRNGKey(0)
    B, T, N = 32, 8, 16                      # batch, seq_len, node_size
    k0, k1, k2, k3, k4 = jax.random.split(key, 5)

    x = jax.random.normal(k0, (B, T, N), jnp.float32)
    phi_p = jax.random.normal(k1, (N, N), jnp.float32)       # torch.randn(N,N)
    beta = jax.random.normal(k2, (N, 1), jnp.float32)        # torch.randn(N,1)
    gama = jax.random.normal(k3, (1, 1), jnp.float32)        # torch.randn(1,1)
    num_population = 100.0 + 900.0 * jax.random.uniform(k4, (N,), jnp.float32)

    # deterministic 0/1 adjacency: ring graph with self loops (no isolated nodes)
    eye = jnp.eye(N, dtype=jnp.float32)
    adj = jnp.clip(eye + jnp.roll(eye, 1, axis=1) + jnp.roll(eye, -1, axis=1),
                   0.0, 1.0)
    ind = jnp.arange(B, dtype=jnp.int32)

    out, ind_out = sir_gnn_forward(x, ind, adj, phi_p, beta, gama,
                                   num_population)
    out = jax.block_until_ready(out)

    ref, _ = sir_gnn_reference(x, ind, adj, phi_p, beta, gama, num_population)
    assert out.shape == (B, N)
    assert jnp.allclose(out, ref, rtol=1e-3, atol=1e-3), (out, ref)
    print("KERNEL_OK")
</pallas_src>

<mosaic_0001>
module attributes {stable_mosaic.version = 11 : i64} {
  func.func @_param_kernel(%arg0: memref<16x16xf32, #tpu.memory_space<vmem>>, %arg1: memref<16x16xf32, #tpu.memory_space<vmem>>, %arg2: memref<1x16xf32, #tpu.memory_space<vmem>>, %arg3: memref<16x1xf32, #tpu.memory_space<vmem>>, %arg4: memref<16x16xf32, #tpu.memory_space<vmem>>, %arg5: memref<1x16xf32, #tpu.memory_space<vmem>>) attributes {dimension_semantics = [], scalar_prefetch = 0 : i64, scratch_operands = 0 : i64, tpu.core_type = #tpu.core_type<tc>} {
    %c0 = arith.constant 0 : index
    %c0_0 = arith.constant 0 : index
    %0 = vector.load %arg0[%c0, %c0_0] : memref<16x16xf32, #tpu.memory_space<vmem>>, vector<16x16xf32>
    %c0_1 = arith.constant 0 : index
    %c0_2 = arith.constant 0 : index
    %1 = vector.load %arg1[%c0_1, %c0_2] : memref<16x16xf32, #tpu.memory_space<vmem>>, vector<16x16xf32>
    %2 = arith.mulf %1, %0 : vector<16x16xf32>
    %cst = arith.constant 0.000000e+00 : f32
    %3 = vector.broadcast %cst : f32 to vector<16x16xf32>
    %4 = arith.maximumf %2, %3 : vector<16x16xf32>
    %cst_3 = arith.constant dense<0xFF800000> : vector<16xf32>
    %5 = vector.multi_reduction <maximumf>, %4, %cst_3 [0] : vector<16x16xf32> to vector<16xf32>
    %6 = vector.shape_cast %5 : vector<16xf32> to vector<1x16xf32>
    %7 = vector.broadcast %6 : vector<1x16xf32> to vector<16x16xf32>
    %8 = arith.subf %4, %7 : vector<16x16xf32>
    %9 = math.exp %8 : vector<16x16xf32>
    %cst_4 = arith.constant dense<0.000000e+00> : vector<16xf32>
    %10 = vector.multi_reduction <add>, %9, %cst_4 [0] : vector<16x16xf32> to vector<16xf32>
    %11 = vector.shape_cast %10 : vector<16xf32> to vector<1x16xf32>
    %12 = vector.broadcast %11 : vector<1x16xf32> to vector<16x16xf32>
    %13 = arith.divf %9, %12 : vector<16x16xf32>
    %14 = arith.mulf %13, %0 : vector<16x16xf32>
    %c0_5 = arith.constant 0 : index
    %c0_6 = arith.constant 0 : index
    %15 = vector.load %arg3[%c0_5, %c0_6] : memref<16x1xf32, #tpu.memory_space<vmem>>, vector<16x1xf32>
    %16 = vector.broadcast %15 : vector<16x1xf32> to vector<16x16xf32>
    %17 = arith.mulf %14, %16 : vector<16x16xf32>
    %cst_7 = arith.constant dense<0.000000e+00> : vector<16xf32>
    %18 = vector.multi_reduction <add>, %17, %cst_7 [0] : vector<16x16xf32> to vector<16xf32>
    %19 = vector.shape_cast %18 : vector<16xf32> to vector<1x16xf32>
    %c0_8 = arith.constant 0 : index
    %c0_9 = arith.constant 0 : index
    %20 = vector.load %arg2[%c0_8, %c0_9] : memref<1x16xf32, #tpu.memory_space<vmem>>, vector<1x16xf32>
    %21 = arith.divf %20, %19 : vector<1x16xf32>
    %c0_10 = arith.constant 0 : index
    %c0_11 = arith.constant 0 : index
    %22 = vector.load %arg5[%c0_10, %c0_11] : memref<1x16xf32, #tpu.memory_space<vmem>>, vector<1x16xf32>
    tpu.vector_store %arg5[%c0_10, %c0_11], %21 {strides = array<i32>} : memref<1x16xf32, #tpu.memory_space<vmem>>, vector<1x16xf32>,
    %cst_12 = arith.constant dense<0.000000e+00> : vector<16xf32>
    %23 = vector.multi_reduction <add>, %14, %cst_12 [0] : vector<16x16xf32> to vector<16xf32>
    %24 = vector.shape_cast %23 : vector<16xf32> to vector<1x16xf32>
    %25 = vector.broadcast %24 : vector<1x16xf32> to vector<16x16xf32>
    %26 = arith.mulf %14, %25 : vector<16x16xf32>
    %c0_13 = arith.constant 0 : index
    %c0_14 = arith.constant 0 : index
    %27 = vector.load %arg4[%c0_13, %c0_14] : memref<16x16xf32, #tpu.memory_space<vmem>>, vector<16x16xf32>
    tpu.vector_store %arg4[%c0_13, %c0_14], %26 {strides = array<i32>} : memref<16x16xf32, #tpu.memory_space<vmem>>, vector<16x16xf32>,
    return
  }
}

</mosaic_0001>

<bundles_post_ra>
// kernel: tpu_custom_call.1
= control target key start
LH: loop header
LB: loop body
LE: loop exit
PB: predicated region body
PF: predicated region fallthrough
CT: control target
= control target key end

     0   :  { %11 = vsyncpa [#allocation3], 0  ;;  %s335_s0 = inlined_call_operand.vmem [shape: f32[16,16], index: 0, kind: input, shape index: {}]   ;;  %s336_s1 = inlined_call_operand.hbm [shape: f32[16,16], index: 1, kind: input, shape index: {}]   ;;  %s337_s2 = inlined_call_operand.vmem [shape: f32[1,16], index: 2, kind: input, shape index: {}]   ;;  %s338_s3 = inlined_call_operand.vmem [shape: f32[16,1], index: 3, kind: input, shape index: {}]   ;;  %s339_s4 = inlined_call_operand.hbm [shape: f32[16,16], index: 4, kind: output, shape index: {0}]   ;;  %s340_s5 = inlined_call_operand.hbm [shape: f32[1,16], index: 5, kind: output, shape index: {1}]  }
   0x1   :  { %12 = vsyncpa [#allocation4], 0 }
   0x2   :  { %13 = vsyncpa [#allocation7], 0  ;;  %s232_s18 = smov [#allocation2]   ;;  %s160_s22 = scalar_lea.hbm %s336_s1, 256 }
   0x3   :  { %s21_s19 = sshll.u32 %s232_s18, 4  ;;  %p161_p0 = scmp.ne.s32.totalorder %s336_s1, %s160_s22  ;;  %s22_s19 = int_to_ptr.vmem [resolvable:$true] %s21_s19 }
   0x4   :  { %p164_p1 = scmp.lt.u32.totalorder %s160_s22, %s336_s1 }
   0x6   :  { %p166_p2 = pnand %p164_p1, %p161_p0 }
   0x8   :  { %169 = shalt.err (!%p166_p2)
}
   0x9   :  { %s170_s27 = scalar_lea.vmem %s22_s19, 256  ;;  %p175_p4 = scmp.lt.s32.totalorder %s22_s19, %s22_s19 }
   0xa   :  { %p171_p3 = scmp.ne.s32.totalorder %s22_s19, %s170_s27  ;;  %p176_p5 = scmp.lt.s32.totalorder %s170_s27, %s170_s27 }
   0xc   :  { %p177_p6 = por %p176_p5, %p175_p4 }
   0xe   :  { %p178_p7 = pnand %p177_p6, %p171_p3 }
  0x10   :  { %181 = shalt.err (!%p178_p7)
}
  0x11   :  { %s233_s28 = smov 128   ;;  %s234_s29 = smov 8  }
  0x12   :  { %27 = dma.hbm_to_vmem [thread:$0]  %s336_s1, 256, %s22_s19, [#allocation3], %s233_s28, %s233_s28, %s234_s29  }
  0x13   :  { %226 = dma.done.wait [#allocation3], 256  }
  0x14   :  { %227 = vsyncadd [#allocation3], 4294967040  ;;  %v235_v0 = vmov 0   ;;  %v73_v1 = vld [vmem:[%s338_s3] sm:$0xff]  ;;  %v36_v3 = vld [vmem:[%s335_s0 + $0x8] sm:$0xff]  ;;  %vm43_vm0 = vcmask 130048  }
  0x15   :  { %151 = vset.pattern.permute.xlu0 %v235_v0  ;;  %v35_v2 = vld [vmem:[%s335_s0] sm:$0xff]  ;;  %v38_v5 = vld [vmem:[#allocation2 + $0x8] sm:$0xff]  ;;  %s236_s0 = smov [#allocation5]  }
  0x16   :  { %77 = vperm.xlu0 %151, %v73_v1   ;;  %v37_v4 = vld [vmem:[#allocation2] sm:$0xff]  ;;  %v74_v6 = vld [vmem:[%s338_s3 + $0x8] sm:$0xff]  ;;  %v40_v8 = vmul.f32 %v38_v5, %v36_v3  ;;  %s119_s3 = sshll.u32 %s236_s0, 4  ;;  %s120_s3 = int_to_ptr.vmem [resolvable:$true] %s119_s3 }
  0x17   :  { %v39_v7 = vmul.f32 %v37_v4, %v35_v2  ;;  %s182_s14 = scalar_lea.vmem %s120_s3, 256  ;;  %p187_p9 = scmp.lt.s32.totalorder %s120_s3, %s120_s3 }
  0x18   :  { %v42_v10 = vmax.f32 %v40_v8, 0.0  ;;  %p183_p8 = scmp.ne.s32.totalorder %s120_s3, %s182_s14  ;;  %p188_p10 = scmp.lt.s32.totalorder %s182_s14, %s182_s14 }
  0x19   :  { %v41_v9 = vmax.f32 %v39_v7, 0.0 }
  0x1a   :  { %82 = vperm.xlu0 %151, %v74_v6   ;;  %v45_v12 = vsel %vm43_vm0, %v42_v10, -inf  ;;  %p189_p11 = por %p188_p10, %p187_p9 }
  0x1b   :  { %v44_v11 = vsel %vm43_vm0, %v41_v9, -inf }
  0x1c   :  { %v46_v13 = vmax.f32 %v44_v11, %v45_v12  ;;  %p190_p12 = pnand %p189_p11, %p183_p8 }
  0x1e   :  { %v47_v14 = vrot.slane %v46_v13, 4 }
  0x20   :  { %v48_v15 = vmax.f32 %v46_v13, %v47_v14 }
  0x22   :  { %v49_v16 = vrot.slane %v48_v15, 2 }
  0x24   :  { %v50_v17 = vmax.f32 %v48_v15, %v49_v16 }
  0x26   :  { %v51_v18 = vrot.slane %v50_v17, 1 }
  0x28   :  { %v52_v19 = vmax.f32 %v50_v17, %v51_v18 }
  0x2a   :  { %v53_v20 = vsub.f32 %v41_v9, %v52_v19  ;;  %v54_v21 = vsub.f32 %v42_v10, %v52_v19 }
  0x2c   :  { %v55_v22 = vmul.f32 1.442695, %v53_v20  ;;  %v57_v23 = vmul.f32 1.442695, %v54_v21 }
  0x2e   :  { %152 = vpow2.f32 %v55_v22 }
  0x2f   :  { %154 = vpow2.f32 %v57_v23 }
  0x38   :  { %v153_v24 = vpop.eup %152 }
  0x39   :  { %v155_v25 = vpop.eup %154  ;;  %v59_v26 = vsel %vm43_vm0, %v153_v24, 0.0 }
  0x3a   :  { %v60_v27 = vsel %vm43_vm0, %v155_v25, 0.0 }
  0x3b   :  { %v61_v28 = vadd.f32 %v60_v27, %v59_v26 }
  0x3d   :  { %v62_v29 = vrot.slane %v61_v28, 4 }
  0x3f   :  { %v63_v30 = vadd.f32 %v62_v29, %v61_v28 }
  0x41   :  { %v64_v31 = vrot.slane %v63_v30, 2 }
  0x43   :  { %v65_v32 = vadd.f32 %v64_v31, %v63_v30 }
  0x45   :  { %v66_v33 = vrot.slane %v65_v32, 1 }
  0x47   :  { %v67_v34 = vadd.f32 %v66_v33, %v65_v32 }
  0x49   :  { %156 = vrcp.f32 %v67_v34 }
  0x53   :  { %v157_v35 = vpop.eup %156 }
  0x54   :  { %v69_v36 = vmul.f32 %v157_v35, %v153_v24  ;;  %v70_v37 = vmul.f32 %v157_v35, %v155_v25 }
  0x56   :  { %v71_v38 = vmul.f32 %v69_v36, %v35_v2  ;;  %v72_v39 = vmul.f32 %v70_v37, %v36_v3 }
  0x58   :  { %v101_v40 = vsel %vm43_vm0, %v71_v38, 0.0  ;;  %v102_v41 = vsel %vm43_vm0, %v72_v39, 0.0 }
  0x59   :  { %v103_v42 = vadd.f32 %v102_v41, %v101_v40 }
  0x5b   :  { %v104_v43 = vrot.slane %v103_v42, 4 }
  0x5d   :  { %v105_v44 = vadd.f32 %v104_v43, %v103_v42 }
  0x5f   :  { %v106_v45 = vrot.slane %v105_v44, 2 }
  0x61   :  { %v107_v46 = vadd.f32 %v106_v45, %v105_v44 }
  0x63   :  { %v108_v47 = vrot.slane %v107_v46, 1 }
  0x65   :  { %v109_v48 = vadd.f32 %v108_v47, %v107_v46 }
  0x67   :  { %v110_v49 = vmul.f32 %v109_v48, %v71_v38  ;;  %v111_v50 = vmul.f32 %v109_v48, %v72_v39 }
  0x69   :  { %112 = vst.msk [vmem:[#allocation5] sm:$0xff] %vm43_vm0, %v110_v49  ;;  %113 = vst.msk [vmem:[#allocation5 + $0x8] sm:$0xff] %vm43_vm0, %v111_v50 }
  0x6a   :  { %193 = shalt.err (!%p190_p12)
}
  0x6b   :  { %s194_s17 = scalar_lea.hbm %s339_s4, 256 }
  0x6c   :  { %p195_p13 = scmp.ne.s32.totalorder %s339_s4, %s194_s17  ;;  %p198_p0 = scmp.lt.u32.totalorder %s194_s17, %s339_s4 }
  0x6e   :  { %p200_p1 = pnand %p198_p0, %p195_p13 }
  0x70   :  { %203 = shalt.err (!%p200_p1)
}
  0x71   :  { %125 = dma.vmem_to_hbm [thread:$0]  %s120_s3, 256, %s339_s4, [#allocation4], %s233_s28, %s233_s28, %s234_s29   ;;  %vm99_vm1 = vcmask 122880  }
  0x72   :  { %v96_v0 = vld [vmem:[%s337_s2] sm:$0x1]  ;;  %s237_s4 = smov [#allocation6]  }
  0x73   :  { %s132_s26 = sshll.u32 %s237_s4, 4  ;;  %s133_s26 = int_to_ptr.vmem [resolvable:$true] %s132_s26 }
  0x74   :  { %s204_s27 = scalar_lea.vmem %s133_s26, 16  ;;  %s208_s28 = scalar_lea.vmem %s133_s26, 32 }
  0x75   :  { %p205_p2 = scmp.ne.s32.totalorder %s133_s26, %s204_s27  ;;  %p209_p3 = scmp.lt.s32.totalorder %s133_s26, %s133_s26 }
  0x76   :  { %p210_p4 = scmp.lt.s32.totalorder %s208_s28, %s204_s27 }
  0x78   :  { %p211_p5 = por %p210_p4, %p209_p3 }
  0x7a   :  { %p212_p6 = pnand %p211_p5, %p205_p2 }
  0x95   :  { %v78_v51 = vpop.permute.xlu0 %77 }
  0x96   :  { %v85_v52 = vmul.f32 %v78_v51, %v71_v38 }
  0x98   :  { %v87_v55 = vsel %vm43_vm0, %v85_v52, 0.0 }
  0x99   :  { %v83_v53 = vpop.permute.xlu0 %82 }
  0x9a   :  { %v86_v54 = vmul.f32 %v83_v53, %v72_v39 }
  0x9c   :  { %v88_v56 = vsel %vm43_vm0, %v86_v54, 0.0 }
  0x9d   :  { %v89_v57 = vadd.f32 %v88_v56, %v87_v55 }
  0x9f   :  { %v90_v58 = vrot.slane %v89_v57, 4 }
  0xa1   :  { %v91_v59 = vadd.f32 %v90_v58, %v89_v57 }
  0xa3   :  { %v92_v60 = vrot.slane %v91_v59, 2 }
  0xa5   :  { %v93_v61 = vadd.f32 %v92_v60, %v91_v59 }
  0xa7   :  { %v94_v62 = vrot.slane %v93_v61, 1 }
  0xa9   :  { %v95_v63 = vadd.f32 %v94_v62, %v93_v61 }
  0xab   :  { %158 = vrcp.f32 %v95_v63 }
  0xb5   :  { %v159_v1 = vpop.eup %158 }
  0xb6   :  { %v98_v2 = vmul.f32 %v159_v1, %v96_v0 }
  0xb8   :  { %100 = vst.msk [vmem:[#allocation6] sm:$0x1] %vm99_vm1, %v98_v2 }
  0xb9   :  { %215 = shalt.err (!%p212_p6)
}
  0xba   :  { %s216_s6 = scalar_lea.hbm %s340_s5, 16 }
  0xbb   :  { %p217_p7 = scmp.ne.s32.totalorder %s340_s5, %s216_s6  ;;  %p220_p8 = scmp.lt.u32.totalorder %s216_s6, %s340_s5 }
  0xbd   :  { %p222_p9 = pnand %p220_p8, %p217_p7 }
  0xbf   :  { %225 = shalt.err (!%p222_p9)
}
  0xc0   :  { %135 = dma.vmem_to_hbm [thread:$0]  %s133_s26, 16, %s340_s5, [#allocation7]  }
  0xc1   :  { %228 = dma.done.wait [#allocation4], 256  }
  0xc2   :  { %229 = vsyncadd [#allocation4], 4294967040 }
  0xc3   :  { %230 = dma.done.wait [#allocation7], 16  }
  0xc4   :  { %231 = vsyncadd [#allocation7], 4294967280 }
  0xc5   :  { %142 = vsyncpa [#allocation3], 1 }
  0xc6   :  { %143 = vsyncpa [#allocation4], 1 }
  0xc7   :  { %144 = vsyncpa [#allocation7], 1 }

</bundles_post_ra>
